<compile_context>
chip_gen: v7x
topology: tpu7x:2x2x1
jax: 0.10.0
libtpu: 0.0.40
codegen_flags: <defaults>
</compile_context>

<pallas_src>
import functools

import jax
import jax.numpy as jnp
from jax.experimental import pallas as pl
from jax.experimental.pallas import tpu as pltpu

_LANE_CANDIDATES = (2048, 1024, 512, 256, 128)
_TARGET_TILE_ELEMS = 256 * 1024  # ~1 MiB of f32 per input block


def _gce_elementwise_f32(o, t):
    # t*log(t/o) + (1-t)*log((1-t)/(1-o)), with logs split to shorten the EUP chain.
    return t * (jnp.log(t) - jnp.log(o)) + (1.0 - t) * (
        jnp.log(1.0 - t) - jnp.log(1.0 - o)
    )


# ---------------------------------------------------------------------------
# Kernel 1: elementwise loss (reduction='none')
# ---------------------------------------------------------------------------
def _gce_none_kernel(pred_ref, tgt_ref, loss_ref):
    o = pred_ref[...].astype(jnp.float32)
    t = tgt_ref[...].astype(jnp.float32)
    loss_ref[...] = _gce_elementwise_f32(o, t).astype(loss_ref.dtype)


# ---------------------------------------------------------------------------
# Kernel 2: summed loss (reduction='sum' / 'mean')
#   grid = (num_splits ["parallel"], steps ["arbitrary"])
#   Accumulates a full-tile vector accumulator per split; reduces to a scalar
#   once at the end and writes it into a disjoint lane-dense (8,128) out block.
# ---------------------------------------------------------------------------
def _gce_sum_kernel(pred_ref, tgt_ref, part_ref, acc_ref, *,
                    rows_per_split, tile_rows, masked):
    j = pl.program_id(1)

    @pl.when(j == 0)
    def _():
        acc_ref[...] = jnp.zeros_like(acc_ref)

    o = pred_ref[0].astype(jnp.float32)   # (tile_rows, W)
    t = tgt_ref[0].astype(jnp.float32)
    loss = _gce_elementwise_f32(o, t)
    if masked:
        # Ragged last block: zero out rows beyond the real extent of this split.
        row_ids = jax.lax.broadcasted_iota(jnp.int32, loss.shape, 0) + j * tile_rows
        loss = jnp.where(row_ids < rows_per_split, loss, 0.0)
    acc_ref[...] += loss  # pure VPU add per step

    @pl.when(j == pl.num_programs(1) - 1)
    def _():
        total = jnp.sum(acc_ref[...])  # single cross-lane reduce per split
        sel = (jax.lax.broadcasted_iota(jnp.int32, (8, 128), 0) == 0) & (
            jax.lax.broadcasted_iota(jnp.int32, (8, 128), 1) == 0
        )
        part_ref[...] = jnp.where(sel, total, 0.0)


# ---------------------------------------------------------------------------
# Layout helpers (all static / trace-time Python ints)
# ---------------------------------------------------------------------------
def _choose_layout(n):
    """Return (lane_width, rows, pad_elems) for a [rows, lane_width] 2D view."""
    for w in _LANE_CANDIDATES:
        if n % w == 0:
            return w, n // w, 0
    w = 128
    pad = (-n) % w
    return w, (n + pad) // w, pad


def _choose_tile_rows(rows_dim, lane_w):
    target = max(8, (_TARGET_TILE_ELEMS // lane_w) // 8 * 8)
    if rows_dim <= target:
        return rows_dim   # single block == full dim (allowed even if not mult. of 8)
    return target         # multiple of 8; last block may be ragged


@functools.partial(jax.jit, static_argnames=("reduction",))
def gce_loss(output, target, reduction="none"):
    assert reduction in ("none", "mean", "sum")
    orig_shape = output.shape
    out_dtype = output.dtype
    n = output.size

    w, rows, pad = _choose_layout(n)
    flat_o = output.reshape(-1)
    flat_t = target.reshape(-1)
    if pad:
        # Fallback copy (only when n is not a multiple of 128).
        # 0.5 / 0.5 gives exactly zero loss, so padding is neutral for sums.
        flat_o = jnp.concatenate(
            [flat_o, jnp.full((pad,), 0.5, dtype=flat_o.dtype)])
        flat_t = jnp.concatenate(
            [flat_t, jnp.full((pad,), 0.5, dtype=flat_t.dtype)])
    o2d = flat_o.reshape(rows, w)
    t2d = flat_t.reshape(rows, w)

    if reduction == "none":
        tile_rows = _choose_tile_rows(rows, w)
        nblocks = pl.cdiv(rows, tile_rows)
        spec = pl.BlockSpec((tile_rows, w), lambda i: (i, 0))
        loss2d = pl.pallas_call(
            _gce_none_kernel,
            out_shape=jax.ShapeDtypeStruct((rows, w), out_dtype),
            grid_spec=pltpu.PrefetchScalarGridSpec(
                num_scalar_prefetch=0,
                grid=(nblocks,),
                in_specs=[spec, spec],
                out_specs=spec,
            ),
            compiler_params=pltpu.CompilerParams(
                dimension_semantics=("parallel",)),
        )(o2d, t2d)
        if pad:
            return loss2d.reshape(-1)[:n].reshape(orig_shape)
        return loss2d.reshape(orig_shape)

    # ---- 'sum' / 'mean' ----------------------------------------------------
    num_splits = 2 if (rows >= 2 and rows % 2 == 0) else 1
    rows_per_split = rows // num_splits
    tile_rows = _choose_tile_rows(rows_per_split, w)
    steps = pl.cdiv(rows_per_split, tile_rows)
    masked = (steps * tile_rows) != rows_per_split

    o3d = o2d.reshape(num_splits, rows_per_split, w)
    t3d = t2d.reshape(num_splits, rows_per_split, w)

    in_spec = pl.BlockSpec((1, tile_rows, w), lambda s, j: (s, j, 0))
    out_spec = pl.BlockSpec((8, 128), lambda s, j: (0, s))

    kernel = functools.partial(
        _gce_sum_kernel,
        rows_per_split=rows_per_split,
        tile_rows=tile_rows,
        masked=masked,
    )

    partials = pl.pallas_call(
        kernel,
        out_shape=jax.ShapeDtypeStruct((8, num_splits * 128), jnp.float32),
        grid_spec=pltpu.PrefetchScalarGridSpec(
            num_scalar_prefetch=0,
            grid=(num_splits, steps),
            in_specs=[in_spec, in_spec],
            out_specs=out_spec,
            scratch_shapes=[pltpu.VMEM((tile_rows, w), jnp.float32)],
        ),
        compiler_params=pltpu.CompilerParams(
            dimension_semantics=("parallel", "arbitrary")),
    )(o3d, t3d)

    total = jnp.sum(partials)  # tiny (8, num_splits*128) combine outside kernel
    if reduction == "sum":
        return total.astype(out_dtype)
    return (total / jnp.float32(n)).astype(out_dtype)  # mean


# ---------------------------------------------------------------------------
# Self-test
# ---------------------------------------------------------------------------
def _reference(o, t):
    # Literal translation of the PyTorch forward.
    return t * jnp.log(t / o) + (1.0 - t) * jnp.log((1.0 - t) / (1.0 - o))


if __name__ == "__main__":
    key = jax.random.PRNGKey(0)

    def make_inputs(k, shape):
        k1, k2 = jax.random.split(k)
        o = jax.random.uniform(k1, shape, jnp.float32, 0.05, 0.95)
        t = jax.random.uniform(k2, shape, jnp.float32, 0.05, 0.95)
        return o, t

    # Primary NCHW case (lane-dense, no padding path).
    k0, k1, k2 = jax.random.split(key, 3)
    shape = (2, 4, 16, 16)
    output, target = make_inputs(k0, shape)
    ref = _reference(output, target)

    loss_none = jax.block_until_ready(gce_loss(output, target, "none"))
    loss_sum = jax.block_until_ready(gce_loss(output, target, "sum"))
    loss_mean = jax.block_until_ready(gce_loss(output, target, "mean"))

    assert loss_none.shape == shape
    assert jnp.allclose(loss_none, ref, rtol=1e-5, atol=1e-5)
    assert jnp.allclose(loss_sum, ref.sum(), rtol=1e-4, atol=1e-3)
    assert jnp.allclose(loss_mean, ref.mean(), rtol=1e-4, atol=1e-5)

    # Exercises the 2-way parallel split of the reduction grid.
    o2, t2 = make_inputs(k1, (8, 16, 32))
    ref2 = _reference(o2, t2)
    s2 = jax.block_until_ready(gce_loss(o2, t2, "sum"))
    assert jnp.allclose(s2, ref2.sum(), rtol=1e-4, atol=1e-3)

    # Exercises the padded-fallback path (n not a multiple of 128).
    o3, t3 = make_inputs(k2, (3, 5, 7))
    ref3 = _reference(o3, t3)
    n3 = jax.block_until_ready(gce_loss(o3, t3, "none"))
    m3 = jax.block_until_ready(gce_loss(o3, t3, "mean"))
    assert n3.shape == (3, 5, 7)
    assert jnp.allclose(n3, ref3, rtol=1e-5, atol=1e-5)
    assert jnp.allclose(m3, ref3.mean(), rtol=1e-4, atol=1e-5)

    print("KERNEL_OK")
</pallas_src>

<mosaic_0001>
module attributes {stable_mosaic.version = 11 : i64} {
  func.func @_gce_none_kernel(%arg0: i32, %arg1: memref<1x2048xf32, #tpu.memory_space<vmem>>, %arg2: memref<1x2048xf32, #tpu.memory_space<vmem>>, %arg3: memref<1x2048xf32, #tpu.memory_space<vmem>>) attributes {dimension_semantics = [#tpu.dimension_semantics<parallel>], iteration_bounds = array<i64: 1>, scalar_prefetch = 0 : i64, scratch_operands = 0 : i64, tpu.core_type = #tpu.core_type<tc>, window_params = [{transform_indices = @transform_0, window_bounds = array<i64: 1, 2048>}, {transform_indices = @transform_1, window_bounds = array<i64: 1, 2048>}, {transform_indices = @transform_2, window_bounds = array<i64: 1, 2048>}]} {
    %c0 = arith.constant 0 : index
    %c0_0 = arith.constant 0 : index
    %0 = vector.load %arg1[%c0, %c0_0] : memref<1x2048xf32, #tpu.memory_space<vmem>>, vector<1x2048xf32>
    %c0_1 = arith.constant 0 : index
    %c0_2 = arith.constant 0 : index
    %1 = vector.load %arg2[%c0_1, %c0_2] : memref<1x2048xf32, #tpu.memory_space<vmem>>, vector<1x2048xf32>
    %2 = math.log %1 : vector<1x2048xf32>
    %3 = math.log %0 : vector<1x2048xf32>
    %4 = arith.subf %2, %3 : vector<1x2048xf32>
    %5 = arith.mulf %1, %4 : vector<1x2048xf32>
    %cst = arith.constant 1.000000e+00 : f32
    %6 = vector.broadcast %cst : f32 to vector<1x2048xf32>
    %7 = arith.subf %6, %1 : vector<1x2048xf32>
    %cst_3 = arith.constant 1.000000e+00 : f32
    %8 = vector.broadcast %cst_3 : f32 to vector<1x2048xf32>
    %9 = arith.subf %8, %1 : vector<1x2048xf32>
    %10 = math.log %9 : vector<1x2048xf32>
    %cst_4 = arith.constant 1.000000e+00 : f32
    %11 = vector.broadcast %cst_4 : f32 to vector<1x2048xf32>
    %12 = arith.subf %11, %0 : vector<1x2048xf32>
    %13 = math.log %12 : vector<1x2048xf32>
    %14 = arith.subf %10, %13 : vector<1x2048xf32>
    %15 = arith.mulf %7, %14 : vector<1x2048xf32>
    %16 = arith.addf %5, %15 : vector<1x2048xf32>
    %c0_5 = arith.constant 0 : index
    %c0_6 = arith.constant 0 : index
    %17 = vector.load %arg3[%c0_5, %c0_6] : memref<1x2048xf32, #tpu.memory_space<vmem>>, vector<1x2048xf32>
    tpu.vector_store %arg3[%c0_5, %c0_6], %16 {strides = array<i32>} : memref<1x2048xf32, #tpu.memory_space<vmem>>, vector<1x2048xf32>,
    return
  }
  func.func @transform_0(%arg0: i32) -> (i32, i32) {
    %c0_i32 = arith.constant 0 : i32
    %c0_i32_0 = arith.constant 0 : i32
    return %arg0, %c0_i32 : i32, i32
  }
  func.func @transform_1(%arg0: i32) -> (i32, i32) {
    %c0_i32 = arith.constant 0 : i32
    %c0_i32_0 = arith.constant 0 : i32
    return %arg0, %c0_i32 : i32, i32
  }
  func.func @transform_2(%arg0: i32) -> (i32, i32) {
    %c0_i32 = arith.constant 0 : i32
    %c0_i32_0 = arith.constant 0 : i32
    return %arg0, %c0_i32 : i32, i32
  }
}

</mosaic_0001>

<bundles_post_ra>
// kernel: gce_loss.1
= control target key start
LH: loop header
LB: loop body
LE: loop exit
PB: predicated region body
PF: predicated region fallthrough
CT: control target
= control target key end

     0   :  { %s100_s0 = inlined_call_operand.vmem [shape: f32[1,2048], index: 0, kind: input, shape index: {}]   ;;  %s101_s1 = inlined_call_operand.vmem [shape: f32[1,2048], index: 1, kind: input, shape index: {}]   ;;  %s102_s2 = inlined_call_operand.vmem [shape: f32[1,2048], index: 2, kind: output, shape index: {}]  }
   0x1   :  { %v11_v0 = vld [vmem:[%s100_s0] sm:$0xff]  ;;  %v12_v4 = vld [vmem:[%s100_s0 + $0x8] sm:$0xff] }
   0x2   :  { %v13_v1 = vld [vmem:[%s101_s1] sm:$0xff]  ;;  %v33_v3 = vsub.f32 1.0, %v11_v0  ;;  %v14_v5 = vld [vmem:[%s101_s1 + $0x8] sm:$0xff]  ;;  %v34_v7 = vsub.f32 1.0, %v12_v4 }
   0x3   :  { %51 = vlog2.f32 %v13_v1  ;;  %v27_v2 = vsub.f32 1.0, %v13_v1  ;;  %v28_v6 = vsub.f32 1.0, %v14_v5 }
   0x4   :  { %53 = vlog2.f32 %v11_v0 }
   0x5   :  { %55 = vlog2.f32 %v27_v2 }
   0x6   :  { %57 = vlog2.f32 %v33_v3 }
   0x7   :  { %59 = vlog2.f32 %v14_v5 }
   0x8   :  { %61 = vlog2.f32 %v12_v4 }
   0x9   :  { %63 = vlog2.f32 %v28_v6 }
   0xa   :  { %65 = vlog2.f32 %v34_v7 }
   0xd   :  { %v52_v8 = vpop.eup %51 }
   0xe   :  { %v54_v9 = vpop.eup %53  ;;  %v16_v10 = vmul.f32 0.6931472, %v52_v8 }
   0xf   :  { %v56_v11 = vpop.eup %55  ;;  %v20_v12 = vmul.f32 0.6931472, %v54_v9 }
  0x10   :  { %v58_v13 = vpop.eup %57  ;;  %v30_v14 = vmul.f32 0.6931472, %v56_v11 }
  0x11   :  { %v60_v15 = vpop.eup %59  ;;  %v23_v16 = vsub.f32 %v16_v10, %v20_v12  ;;  %v36_v17 = vmul.f32 0.6931472, %v58_v13 }
  0x12   :  { %v62_v18 = vpop.eup %61  ;;  %v18_v19 = vmul.f32 0.6931472, %v60_v15 }
  0x13   :  { %v64_v20 = vpop.eup %63  ;;  %v25_v21 = vmul.f32 %v23_v16, %v13_v1  ;;  %v39_v22 = vsub.f32 %v30_v14, %v36_v17  ;;  %v22_v23 = vmul.f32 0.6931472, %v62_v18 }
  0x14   :  { %v66_v24 = vpop.eup %65  ;;  %v32_v25 = vmul.f32 0.6931472, %v64_v20 }
  0x15   :  { %v41_v26 = vmul.f32 %v39_v22, %v27_v2  ;;  %v24_v27 = vsub.f32 %v18_v19, %v22_v23  ;;  %v38_v28 = vmul.f32 0.6931472, %v66_v24 }
  0x17   :  { %v43_v29 = vadd.f32 %v41_v26, %v25_v21  ;;  %v26_v30 = vmul.f32 %v24_v27, %v14_v5  ;;  %v40_v31 = vsub.f32 %v32_v25, %v38_v28 }
  0x19   :  { %45 = vst [vmem:[%s102_s2] sm:$0xff] %v43_v29  ;;  %v42_v32 = vmul.f32 %v40_v31, %v28_v6 }
  0x1b   :  { %v44_v33 = vadd.f32 %v42_v32, %v26_v30 }
  0x1d   :  { %46 = vst [vmem:[%s102_s2 + $0x8] sm:$0xff] %v44_v33 }

</bundles_post_ra>
